<compile_context>
chip_gen: v7x
topology: tpu7x:2x2x1
jax: 0.10.0
libtpu: 0.0.40
codegen_flags: <defaults>
</compile_context>

<pallas_src>
import functools

import jax
import jax.numpy as jnp
from jax import lax
from jax.experimental import pallas as pl
from jax.experimental.pallas import tpu as pltpu

_LANE = 128      # last block dim must be a multiple of 128 (or the full dim)
_SUBLANE = 8     # 2nd-to-last block dim must be a multiple of 8 (or full dim)


# --------------------------------------------------------------------------
# Generation-aware sizing helpers
# --------------------------------------------------------------------------
def _round_up(v, m):
    return (v + m - 1) // m * m


def _vmem_capacity_bytes():
    """Physical VMEM per core; conservative (v7x) fallback if query fails."""
    try:
        cap = getattr(pltpu.get_tpu_info(), "vmem_capacity_bytes", None)
        if cap:
            return int(cap)
    except Exception:
        pass
    return 64 * 1024 * 1024


def _vmem_budget():
    """(per-block slab budget, vmem_limit_bytes) for the current generation.

    A "slab" is one logical (N, Cb, HWt) input (== output) block.  Pipeline
    footprint is ~4x a slab (input + output, each double-buffered) plus an
    in-kernel f32 temporary, so cap the slab at capacity/8:
      v5e/v6e (128 MiB VMEM) -> 16 MiB slab, vmem_limit 96 MiB
      v7x     ( 64 MiB VMEM) ->  8 MiB slab, vmem_limit 48 MiB
    Slabs of a few MiB already amortize the ~0.35 us per-grid-step overhead.
    """
    cap = _vmem_capacity_bytes()
    slab_budget = max(2 << 20, cap // 8)
    vmem_limit = (cap // 4) * 3
    return slab_budget, vmem_limit


def _choose_channel_block(C, bytes_per_channel, budget):
    """Largest channel block dividing C, obeying the sublane rule, fitting budget."""
    if C % _SUBLANE != 0:
        # TODO(synk): for C < 8 the sublane axis is half-empty; a (N*C, HW)
        # flattening with per-row scale/shift would pack vregs fully.
        return C
    cb = min(C, max(_SUBLANE,
                    (budget // max(bytes_per_channel, 1)) // _SUBLANE * _SUBLANE))
    while C % cb != 0:
        cb -= _SUBLANE
    return max(cb, _SUBLANE)


def _choose_hw_tile(HWp, bytes_per_lane, budget):
    """Largest lane tile (multiple of 128) dividing HWp that fits the budget."""
    max_t = max(_LANE, (budget // max(bytes_per_lane, 1)) // _LANE * _LANE)
    t = min(HWp, max_t)
    while HWp % t != 0:
        t -= _LANE
    return max(t, _LANE)


def _pad_lanes(x3, HWp):
    """Zero-pad the H*W axis to a multiple of 128 (unmasked, lane-dense vst).

    Zero padding keeps the batch statistics exact: padded elements contribute
    nothing to sum / sum-of-squares and we divide by the true N*H*W count.
    """
    HW = x3.shape[-1]
    if HWp == HW:
        return x3
    return jnp.pad(x3, ((0, 0), (0, 0), (0, HWp - HW)))


# --------------------------------------------------------------------------
# Kernels
# --------------------------------------------------------------------------
def _bn_fused_train_kernel(x_ref, w_ref, b_ref, out_ref, mean_ref, var_ref, *,
                           eps, count):
    """Fused training BN for one channel block: stats + normalize + affine.

    x_ref/out_ref: (N, Cb, HWp) in the input dtype; w/b/mean/var: (1, Cb, 1) f32.
    One-pass sum / sum-of-squares (no block-sized 'centered' temp), f32 accum.
    """
    x = x_ref[...].astype(jnp.float32)                           # (N, Cb, HWp)
    inv_count = 1.0 / count
    # Lane reduce (XLU) then N reduce (VPU); both hide under the DMA.
    sum_x = jnp.sum(jnp.sum(x, axis=2, keepdims=True), axis=0, keepdims=True)
    sum_x2 = jnp.sum(jnp.sum(x * x, axis=2, keepdims=True), axis=0,
                     keepdims=True)
    mean = sum_x * inv_count                                     # (1, Cb, 1)
    var = jnp.maximum(sum_x2 * inv_count - mean * mean, 0.0)     # biased var
    inv_std = lax.rsqrt(var + eps)                               # EUP
    scale = w_ref[...] * inv_std
    shift = b_ref[...] - mean * scale
    out_ref[...] = (x * scale + shift).astype(out_ref.dtype)
    mean_ref[...] = mean
    var_ref[...] = var


def _bn_stats_kernel(x_ref, sum_ref, sq_ref):
    """Large-activation pass 1: accumulate per-channel sum / sum-of-squares.

    Grid = (channel blocks [parallel], HW tiles [arbitrary, last]); the
    (1, Cb, 1) outputs act as accumulators resident in VMEM across the HW axis.
    """
    @pl.when(pl.program_id(1) == 0)
    def _():
        sum_ref[...] = jnp.zeros_like(sum_ref)
        sq_ref[...] = jnp.zeros_like(sq_ref)

    x = x_ref[...].astype(jnp.float32)
    sum_ref[...] += jnp.sum(jnp.sum(x, axis=2, keepdims=True), axis=0,
                            keepdims=True)
    sq_ref[...] += jnp.sum(jnp.sum(x * x, axis=2, keepdims=True), axis=0,
                           keepdims=True)


def _bn_apply_kernel(x_ref, scale_ref, shift_ref, out_ref):
    """Elementwise normalize with pre-folded per-channel scale / shift."""
    x = x_ref[...].astype(jnp.float32)
    out_ref[...] = (x * scale_ref[...] + shift_ref[...]).astype(out_ref.dtype)


# --------------------------------------------------------------------------
# pallas_call wrappers
# --------------------------------------------------------------------------
def _bn_batch_stats(x3, count, slab_budget, vmem_limit):
    """Per-channel (mean, biased var) of an (N, C, HWp) slab, tiled over HW."""
    N, C, HWp = x3.shape
    itemsize = jnp.dtype(x3.dtype).itemsize
    cb = C if C % _SUBLANE != 0 else _SUBLANE
    hwt = _choose_hw_tile(HWp, N * cb * itemsize, slab_budget)
    # TODO(synk): also tile over N for extreme batch sizes where even an
    # (N, 8, 128) tile exceeds the per-generation VMEM budget.
    grid = (C // cb, HWp // hwt)
    sum3, sq3 = pl.pallas_call(
        _bn_stats_kernel,
        out_shape=(jax.ShapeDtypeStruct((1, C, 1), jnp.float32),
                   jax.ShapeDtypeStruct((1, C, 1), jnp.float32)),
        grid=grid,
        in_specs=[pl.BlockSpec((N, cb, hwt), lambda c, t: (0, c, t))],
        out_specs=(pl.BlockSpec((1, cb, 1), lambda c, t: (0, c, 0)),
                   pl.BlockSpec((1, cb, 1), lambda c, t: (0, c, 0))),
        compiler_params=pltpu.CompilerParams(
            dimension_semantics=("parallel", "arbitrary"),
            vmem_limit_bytes=vmem_limit),
    )(x3)
    mean = sum3.reshape(C) / count
    var = jnp.maximum(sq3.reshape(C) / count - mean * mean, 0.0)
    return mean, var


def _bn_apply(x3, scale, shift, slab_budget, vmem_limit):
    """out = x * scale + shift over an (N, C, HWp) slab (tiled, pipelined)."""
    N, C, HWp = x3.shape
    itemsize = jnp.dtype(x3.dtype).itemsize
    cb = _choose_channel_block(C, N * HWp * itemsize, slab_budget)
    hwt = _choose_hw_tile(HWp, N * cb * itemsize, slab_budget)
    grid = (C // cb, HWp // hwt)
    s3 = scale.reshape(1, C, 1).astype(jnp.float32)
    h3 = shift.reshape(1, C, 1).astype(jnp.float32)
    return pl.pallas_call(
        _bn_apply_kernel,
        out_shape=jax.ShapeDtypeStruct((N, C, HWp), x3.dtype),
        grid=grid,
        in_specs=[pl.BlockSpec((N, cb, hwt), lambda c, t: (0, c, t)),
                  pl.BlockSpec((1, cb, 1), lambda c, t: (0, c, 0)),
                  pl.BlockSpec((1, cb, 1), lambda c, t: (0, c, 0))],
        out_specs=pl.BlockSpec((N, cb, hwt), lambda c, t: (0, c, t)),
        compiler_params=pltpu.CompilerParams(
            dimension_semantics=("parallel", "parallel"),
            vmem_limit_bytes=vmem_limit),
    )(x3, s3, h3)


def batchnorm2d_train(x, weight, bias, running_mean, running_var,
                      num_batches_tracked, *, eps=1e-5, momentum=0.1):
    """Training-mode forward of the spec BatchNorm2d (self.training == True).

    Returns (out, new_running_mean, new_running_var, new_num_batches_tracked).
    The spec module updates running_var with the *biased* batch variance
    (torch.var(..., unbiased=False)); we follow the spec exactly.
    """
    N, C, H, W = x.shape
    HW = H * W
    HWp = _round_up(HW, _LANE)
    itemsize = jnp.dtype(x.dtype).itemsize
    slab_budget, vmem_limit = _vmem_budget()
    count = float(N * HW)

    # Native-dtype slab (free contiguous reshape); lane-pad only if HW % 128.
    x3 = _pad_lanes(x.reshape(N, C, HW), HWp)
    w3 = weight.reshape(1, C, 1).astype(jnp.float32)
    b3 = bias.reshape(1, C, 1).astype(jnp.float32)

    per_channel_bytes = N * HWp * itemsize
    min_cb = C if C % _SUBLANE != 0 else _SUBLANE

    if per_channel_bytes * min_cb <= slab_budget:
        # Fused single-pass path: 1 HBM read + 1 HBM write of x.  Channel-tiled
        # grid -> double-buffered DMA + megacore sharding ("parallel") on v7x.
        cb = _choose_channel_block(C, per_channel_bytes, slab_budget)
        out3, mean3, var3 = pl.pallas_call(
            functools.partial(_bn_fused_train_kernel, eps=float(eps),
                              count=count),
            out_shape=(jax.ShapeDtypeStruct((N, C, HWp), x.dtype),
                       jax.ShapeDtypeStruct((1, C, 1), jnp.float32),
                       jax.ShapeDtypeStruct((1, C, 1), jnp.float32)),
            grid=(C // cb,),
            in_specs=[pl.BlockSpec((N, cb, HWp), lambda c: (0, c, 0)),
                      pl.BlockSpec((1, cb, 1), lambda c: (0, c, 0)),
                      pl.BlockSpec((1, cb, 1), lambda c: (0, c, 0))],
            out_specs=(pl.BlockSpec((N, cb, HWp), lambda c: (0, c, 0)),
                       pl.BlockSpec((1, cb, 1), lambda c: (0, c, 0)),
                       pl.BlockSpec((1, cb, 1), lambda c: (0, c, 0))),
            compiler_params=pltpu.CompilerParams(
                dimension_semantics=("parallel",),
                vmem_limit_bytes=vmem_limit),
        )(x3, w3, b3)
        batch_mean = mean3.reshape(C)
        batch_var = var3.reshape(C)
    else:
        # Large-activation path: HW-tiled stats pass + tiled normalize pass
        # (2 HBM reads + 1 write of x); cutover is generation-aware via budget.
        batch_mean, batch_var = _bn_batch_stats(x3, count, slab_budget,
                                                vmem_limit)
        inv_std = lax.rsqrt(batch_var + eps)
        scale = weight * inv_std
        shift = bias - batch_mean * scale
        out3 = _bn_apply(x3, scale, shift, slab_budget, vmem_limit)

    out = out3[..., :HW].reshape(N, C, H, W)
    # Buffer updates: O(C) math, done functionally in the wrapper.
    new_running_mean = (1.0 - momentum) * running_mean + momentum * batch_mean
    new_running_var = (1.0 - momentum) * running_var + momentum * batch_var
    new_num_batches = num_batches_tracked + 1
    return out, new_running_mean, new_running_var, new_num_batches


def batchnorm2d_eval(x, weight, bias, running_mean, running_var, *, eps=1e-5):
    """Inference-mode forward: normalize with the running statistics."""
    N, C, H, W = x.shape
    HW = H * W
    HWp = _round_up(HW, _LANE)
    slab_budget, vmem_limit = _vmem_budget()

    x3 = _pad_lanes(x.reshape(N, C, HW), HWp)
    # Fold stats + affine into per-channel scale/shift (O(C) wrapper math).
    inv_std = lax.rsqrt(running_var.astype(jnp.float32) + eps)
    scale = weight * inv_std
    shift = bias - running_mean * scale
    out3 = _bn_apply(x3, scale, shift, slab_budget, vmem_limit)
    return out3[..., :HW].reshape(N, C, H, W)


# --------------------------------------------------------------------------
# Self-test
# --------------------------------------------------------------------------
if __name__ == "__main__":
    num_features = 4
    eps, momentum = 1e-5, 0.1

    key = jax.random.PRNGKey(0)
    k_x, k_w, k_b = jax.random.split(key, 3)

    x = jax.random.normal(k_x, (2, num_features, 16, 16), dtype=jnp.float32)
    # Module init is weight=ones, bias=zeros; perturb so the affine path is
    # actually exercised by the correctness check.
    weight = 1.0 + 0.1 * jax.random.normal(k_w, (num_features,),
                                           dtype=jnp.float32)
    bias = 0.1 * jax.random.normal(k_b, (num_features,), dtype=jnp.float32)
    running_mean = jnp.zeros((num_features,), dtype=jnp.float32)
    running_var = jnp.ones((num_features,), dtype=jnp.float32)
    num_batches_tracked = jnp.array(0, dtype=jnp.int32)

    # --- training-mode forward (module default state) ---
    out, new_rm, new_rv, new_nbt = batchnorm2d_train(
        x, weight, bias, running_mean, running_var, num_batches_tracked,
        eps=eps, momentum=momentum)
    out = jax.block_until_ready(out)

    # Pure-JAX reference mirroring the spec module exactly.
    mean_exp = jnp.mean(x, axis=(0, 2, 3))
    var_exp = jnp.var(x, axis=(0, 2, 3))          # ddof=0 == unbiased=False
    ref = ((x - mean_exp[None, :, None, None])
           / jnp.sqrt(var_exp[None, :, None, None] + eps)
           * weight[None, :, None, None] + bias[None, :, None, None])
    rm_exp = (1.0 - momentum) * running_mean + momentum * mean_exp
    rv_exp = (1.0 - momentum) * running_var + momentum * var_exp

    assert out.shape == x.shape == (2, num_features, 16, 16)
    assert out.dtype == x.dtype
    assert jnp.allclose(out, ref, atol=1e-4, rtol=1e-4)
    assert jnp.allclose(new_rm, rm_exp, atol=1e-5, rtol=1e-5)
    assert jnp.allclose(new_rv, rv_exp, atol=1e-5, rtol=1e-5)
    assert int(new_nbt) == 1

    # --- inference-mode forward (uses running stats) ---
    out_eval = jax.block_until_ready(
        batchnorm2d_eval(x, weight, bias, new_rm, new_rv, eps=eps))
    ref_eval = ((x - new_rm[None, :, None, None])
                / jnp.sqrt(new_rv[None, :, None, None] + eps)
                * weight[None, :, None, None] + bias[None, :, None, None])
    assert jnp.allclose(out_eval, ref_eval, atol=1e-4, rtol=1e-4)

    # --- exercise the large-activation (two-pass, HW-tiled) path by forcing a
    #     tiny VMEM budget so both tiled kernels compile and match on TPU ---
    x3 = x.reshape(2, num_features, 16 * 16)
    small_budget, small_limit = 4096, 32 * 1024 * 1024
    bm2, bv2 = jax.block_until_ready(
        _bn_batch_stats(x3, float(2 * 16 * 16), small_budget, small_limit))
    assert jnp.allclose(bm2, mean_exp, atol=1e-5, rtol=1e-5)
    assert jnp.allclose(bv2, var_exp, atol=1e-5, rtol=1e-5)
    inv2 = 1.0 / jnp.sqrt(bv2 + eps)
    out2 = jax.block_until_ready(
        _bn_apply(x3, weight * inv2, bias - bm2 * weight * inv2,
                  small_budget, small_limit))
    assert jnp.allclose(out2.reshape(x.shape), ref, atol=1e-4, rtol=1e-4)

    print("KERNEL_OK")
</pallas_src>

<mosaic_0001>
module attributes {stable_mosaic.version = 11 : i64} {
  func.func @_bn_fused_train_kernel(%arg0: i32, %arg1: memref<2x4x256xf32, #tpu.memory_space<vmem>>, %arg2: memref<1x4x1xf32, #tpu.memory_space<vmem>>, %arg3: memref<1x4x1xf32, #tpu.memory_space<vmem>>, %arg4: memref<2x4x256xf32, #tpu.memory_space<vmem>>, %arg5: memref<1x4x1xf32, #tpu.memory_space<vmem>>, %arg6: memref<1x4x1xf32, #tpu.memory_space<vmem>>) attributes {dimension_semantics = [#tpu.dimension_semantics<parallel>], iteration_bounds = array<i64: 1>, scalar_prefetch = 0 : i64, scratch_operands = 0 : i64, tpu.core_type = #tpu.core_type<tc>, window_params = [{transform_indices = @transform_0, window_bounds = array<i64: 2, 4, 256>}, {transform_indices = @transform_1, window_bounds = array<i64: 1, 4, 1>}, {transform_indices = @transform_2, window_bounds = array<i64: 1, 4, 1>}, {transform_indices = @transform_3, window_bounds = array<i64: 2, 4, 256>}, {transform_indices = @transform_4, window_bounds = array<i64: 1, 4, 1>}, {transform_indices = @transform_5, window_bounds = array<i64: 1, 4, 1>}]} {
    %c0 = arith.constant 0 : index
    %c0_0 = arith.constant 0 : index
    %c0_1 = arith.constant 0 : index
    %0 = vector.load %arg1[%c0, %c0_0, %c0_1] : memref<2x4x256xf32, #tpu.memory_space<vmem>>, vector<2x4x256xf32>
    %cst = arith.constant dense<0.000000e+00> : vector<2x4xf32>
    %1 = vector.multi_reduction <add>, %0, %cst [2] : vector<2x4x256xf32> to vector<2x4xf32>
    %2 = vector.shape_cast %1 : vector<2x4xf32> to vector<2x4x1xf32>
    %cst_2 = arith.constant dense<0.000000e+00> : vector<4x1xf32>
    %3 = vector.multi_reduction <add>, %2, %cst_2 [0] : vector<2x4x1xf32> to vector<4x1xf32>
    %4 = vector.shape_cast %3 : vector<4x1xf32> to vector<1x4x1xf32>
    %5 = arith.mulf %0, %0 : vector<2x4x256xf32>
    %cst_3 = arith.constant dense<0.000000e+00> : vector<2x4xf32>
    %6 = vector.multi_reduction <add>, %5, %cst_3 [2] : vector<2x4x256xf32> to vector<2x4xf32>
    %7 = vector.shape_cast %6 : vector<2x4xf32> to vector<2x4x1xf32>
    %cst_4 = arith.constant dense<0.000000e+00> : vector<4x1xf32>
    %8 = vector.multi_reduction <add>, %7, %cst_4 [0] : vector<2x4x1xf32> to vector<4x1xf32>
    %9 = vector.shape_cast %8 : vector<4x1xf32> to vector<1x4x1xf32>
    %cst_5 = arith.constant 0.001953125 : f32
    %10 = vector.broadcast %cst_5 : f32 to vector<1x4x1xf32>
    %11 = arith.mulf %4, %10 : vector<1x4x1xf32>
    %cst_6 = arith.constant 0.001953125 : f32
    %12 = vector.broadcast %cst_6 : f32 to vector<1x4x1xf32>
    %13 = arith.mulf %9, %12 : vector<1x4x1xf32>
    %14 = arith.mulf %11, %11 : vector<1x4x1xf32>
    %15 = arith.subf %13, %14 : vector<1x4x1xf32>
    %cst_7 = arith.constant 0.000000e+00 : f32
    %16 = vector.broadcast %cst_7 : f32 to vector<1x4x1xf32>
    %17 = arith.maximumf %15, %16 : vector<1x4x1xf32>
    %cst_8 = arith.constant 9.99999974E-6 : f32
    %18 = vector.broadcast %cst_8 : f32 to vector<1x4x1xf32>
    %19 = arith.addf %17, %18 : vector<1x4x1xf32>
    %20 = math.rsqrt %19 : vector<1x4x1xf32>
    %c0_9 = arith.constant 0 : index
    %c0_10 = arith.constant 0 : index
    %c0_11 = arith.constant 0 : index
    %21 = vector.load %arg2[%c0_9, %c0_10, %c0_11] : memref<1x4x1xf32, #tpu.memory_space<vmem>>, vector<1x4x1xf32>
    %22 = arith.mulf %21, %20 : vector<1x4x1xf32>
    %c0_12 = arith.constant 0 : index
    %c0_13 = arith.constant 0 : index
    %c0_14 = arith.constant 0 : index
    %23 = vector.load %arg3[%c0_12, %c0_13, %c0_14] : memref<1x4x1xf32, #tpu.memory_space<vmem>>, vector<1x4x1xf32>
    %24 = arith.mulf %11, %22 : vector<1x4x1xf32>
    %25 = arith.subf %23, %24 : vector<1x4x1xf32>
    %26 = vector.broadcast %22 : vector<1x4x1xf32> to vector<2x4x256xf32>
    %27 = arith.mulf %0, %26 : vector<2x4x256xf32>
    %28 = vector.broadcast %25 : vector<1x4x1xf32> to vector<2x4x256xf32>
    %29 = arith.addf %27, %28 : vector<2x4x256xf32>
    %c0_15 = arith.constant 0 : index
    %c0_16 = arith.constant 0 : index
    %c0_17 = arith.constant 0 : index
    %30 = vector.load %arg4[%c0_15, %c0_16, %c0_17] : memref<2x4x256xf32, #tpu.memory_space<vmem>>, vector<2x4x256xf32>
    tpu.vector_store %arg4[%c0_15, %c0_16, %c0_17], %29 {strides = array<i32>} : memref<2x4x256xf32, #tpu.memory_space<vmem>>, vector<2x4x256xf32>,
    %c0_18 = arith.constant 0 : index
    %c0_19 = arith.constant 0 : index
    %c0_20 = arith.constant 0 : index
    %31 = vector.load %arg5[%c0_18, %c0_19, %c0_20] : memref<1x4x1xf32, #tpu.memory_space<vmem>>, vector<1x4x1xf32>
    tpu.vector_store %arg5[%c0_18, %c0_19, %c0_20], %11 {strides = array<i32>} : memref<1x4x1xf32, #tpu.memory_space<vmem>>, vector<1x4x1xf32>,
    %c0_21 = arith.constant 0 : index
    %c0_22 = arith.constant 0 : index
    %c0_23 = arith.constant 0 : index
    %32 = vector.load %arg6[%c0_21, %c0_22, %c0_23] : memref<1x4x1xf32, #tpu.memory_space<vmem>>, vector<1x4x1xf32>
    tpu.vector_store %arg6[%c0_21, %c0_22, %c0_23], %17 {strides = array<i32>} : memref<1x4x1xf32, #tpu.memory_space<vmem>>, vector<1x4x1xf32>,
    return
  }
  func.func @transform_0(%arg0: i32) -> (i32, i32, i32) {
    %c0_i32 = arith.constant 0 : i32
    %c0_i32_0 = arith.constant 0 : i32
    %c0_i32_1 = arith.constant 0 : i32
    return %c0_i32, %arg0, %c0_i32_0 : i32, i32, i32
  }
  func.func @transform_1(%arg0: i32) -> (i32, i32, i32) {
    %c0_i32 = arith.constant 0 : i32
    %c0_i32_0 = arith.constant 0 : i32
    %c0_i32_1 = arith.constant 0 : i32
    return %c0_i32, %arg0, %c0_i32_0 : i32, i32, i32
  }
  func.func @transform_2(%arg0: i32) -> (i32, i32, i32) {
    %c0_i32 = arith.constant 0 : i32
    %c0_i32_0 = arith.constant 0 : i32
    %c0_i32_1 = arith.constant 0 : i32
    return %c0_i32, %arg0, %c0_i32_0 : i32, i32, i32
  }
  func.func @transform_3(%arg0: i32) -> (i32, i32, i32) {
    %c0_i32 = arith.constant 0 : i32
    %c0_i32_0 = arith.constant 0 : i32
    %c0_i32_1 = arith.constant 0 : i32
    return %c0_i32, %arg0, %c0_i32_0 : i32, i32, i32
  }
  func.func @transform_4(%arg0: i32) -> (i32, i32, i32) {
    %c0_i32 = arith.constant 0 : i32
    %c0_i32_0 = arith.constant 0 : i32
    %c0_i32_1 = arith.constant 0 : i32
    return %c0_i32, %arg0, %c0_i32_0 : i32, i32, i32
  }
  func.func @transform_5(%arg0: i32) -> (i32, i32, i32) {
    %c0_i32 = arith.constant 0 : i32
    %c0_i32_0 = arith.constant 0 : i32
    %c0_i32_1 = arith.constant 0 : i32
    return %c0_i32, %arg0, %c0_i32_0 : i32, i32, i32
  }
}

</mosaic_0001>

<bundles_post_ra>
// kernel: tpu_custom_call.1
= control target key start
LH: loop header
LB: loop body
LE: loop exit
PB: predicated region body
PF: predicated region fallthrough
CT: control target
= control target key end

     0   :  { %11 = vsyncpa [#allocation3], 0  ;;  %s311_s0 = inlined_call_operand.hbm [shape: f32[2,4,256], index: 0, kind: input, shape index: {}]   ;;  %s312_s1 = inlined_call_operand.vmem [shape: f32[1,4,1], index: 1, kind: input, shape index: {}]   ;;  %s313_s2 = inlined_call_operand.vmem [shape: f32[1,4,1], index: 2, kind: input, shape index: {}]   ;;  %s314_s3 = inlined_call_operand.hbm [shape: f32[2,4,256], index: 3, kind: output, shape index: {0}]   ;;  %s315_s4 = inlined_call_operand.vmem [shape: f32[1,4,1], index: 4, kind: output, shape index: {1}]   ;;  %s316_s5 = inlined_call_operand.vmem [shape: f32[1,4,1], index: 5, kind: output, shape index: {2}]  }
   0x1   :  { %12 = vsyncpa [#allocation4], 0  ;;  %s205_s18 = smov [#allocation2]   ;;  %s157_s22 = scalar_lea.hbm %s311_s0, 256 }
   0x2   :  { %s18_s19 = sshll.u32 %s205_s18, 4  ;;  %p158_p0 = scmp.ne.s32.totalorder %s311_s0, %s157_s22  ;;  %s19_s19 = int_to_ptr.vmem [resolvable:$true] %s18_s19 }
   0x3   :  { %p161_p1 = scmp.lt.u32.totalorder %s157_s22, %s311_s0 }
   0x5   :  { %p163_p2 = pnand %p161_p1, %p158_p0 }
   0x7   :  { %166 = shalt.err (!%p163_p2)
}
   0x8   :  { %s167_s27 = scalar_lea.vmem %s19_s19, 256  ;;  %p172_p4 = scmp.lt.s32.totalorder %s19_s19, %s19_s19 }
   0x9   :  { %p168_p3 = scmp.ne.s32.totalorder %s19_s19, %s167_s27  ;;  %p173_p5 = scmp.lt.s32.totalorder %s167_s27, %s167_s27 }
   0xb   :  { %p174_p6 = por %p173_p5, %p172_p4 }
   0xd   :  { %p175_p7 = pnand %p174_p6, %p168_p3 }
   0xf   :  { %178 = shalt.err (!%p175_p7)
}
  0x10   :  { %s206_s28 = smov 128   ;;  %s207_s29 = smov 8  }
  0x11   :  { %24 = dma.hbm_to_vmem [thread:$0]  %s311_s0, 256, %s19_s19, [#allocation3], %s206_s28, %s206_s28, %s207_s29  }
  0x12   :  { %201 = dma.done.wait [#allocation3], 256  }
  0x13   :  { %202 = vsyncadd [#allocation3], 4294967040  ;;  %vm40_vm0 = vcmask 1043456   ;;  %v256_v0 = vld [vmem:[#allocation2] sm:$0xff]  ;;  %v258_v1 = vld [vmem:[#allocation2 + $0x8] sm:$0xff]  ;;  %v208_v20 = vmov 0   ;;  %v94_v45 = vlaneseq }
  0x14   :  { %v36_v2 = vcombine.high %v256_v0, %v256_v0  ;;  %v41_v3 = vsel %vm40_vm0, %v256_v0, 0.0  ;;  %v54_v4 = vmul.f32 %v256_v0, %v256_v0  ;;  %v37_v5 = vcombine.high %v258_v1, %v258_v1  ;;  %151 = vset.pattern.permute.xlu0 %v208_v20  ;;  %152 = vset.pattern.permute.xlu1 %v208_v20  ;;  %v82_v37 = vld [vmem:[%s312_s1] sm:$0xf]  ;;  %s210_s1 = smov [#allocation5]  }
  0x15   :  { %v46_v6 = vsel %vm40_vm0, %v258_v1, 0.0  ;;  %v55_v7 = vmul.f32 %v258_v1, %v258_v1  ;;  %vm117_vm1 = vcmask 3072   ;;  %v84_v40 = vld [vmem:[%s313_s2] sm:$0xf]  ;;  %v209_v43 = vmov 839922192  }
  0x16   :  { %v42_v8 = vsel %vm40_vm0, %v36_v2, 0.0  ;;  %v58_v9 = vcombine.high %v54_v4, %v54_v4  ;;  %v62_v10 = vsel %vm40_vm0, %v54_v4, 0.0  ;;  %v47_v11 = vsel %vm40_vm0, %v37_v5, 0.0 }
  0x17   :  { %v43_v12 = vadd.f32 %v42_v8, %v41_v3  ;;  %v59_v13 = vcombine.high %v55_v7, %v55_v7  ;;  %v67_v15 = vsel %vm40_vm0, %v55_v7, 0.0  ;;  %v48_v17 = vadd.f32 %v47_v11, %v46_v6 }
  0x18   :  { %v63_v14 = vsel %vm40_vm0, %v58_v9, 0.0  ;;  %v92_v44 = vunpack.c.l.s4 %v209_v43  ;;  %v95_v47 = vshrl.u32 %v94_v45, 7 }
  0x19   :  { %44 = vadd.xlane.f32.xlu0 %v43_v12  ;;  %v64_v16 = vadd.f32 %v63_v14, %v62_v10  ;;  %v68_v18 = vsel %vm40_vm0, %v59_v13, 0.0 }
  0x1a   :  { %v69_v19 = vadd.f32 %v68_v18, %v67_v15  ;;  %v93_v46 = vunpack.c.0.s8 %v92_v44 }
  0x1b   :  { %65 = vadd.xlane.f32.xlu1 %v64_v16 }
  0x1c   :  { %v96_v48 = vsub.s32 %v93_v46, %v95_v47 }
  0x1d   :  { %49 = vadd.xlane.f32.xlu0 %v48_v17 }
  0x1f   :  { %70 = vadd.xlane.f32.xlu1 %v69_v19 }
  0xa6   :  { %v45_v21 = vpop.xlane.xlu0 %44 }
  0xa7   :  { %v51_v24 = vsel %vm40_vm0, %v45_v21, 0.0 }
  0xa8   :  { %v66_v22 = vpop.xlane.xlu1 %65 }
  0xa9   :  { %v72_v28 = vsel %vm40_vm0, %v66_v22, 0.0 }
  0xaa   :  { %v50_v23 = vpop.xlane.xlu0 %49 }
  0xab   :  { %v52_v25 = vsel %vm40_vm0, %v50_v23, 0.0 }
  0xac   :  { %v53_v26 = vadd.f32 %v52_v25, %v51_v24  ;;  %v71_v27 = vpop.xlane.xlu1 %70 }
  0xad   :  { %v73_v29 = vsel %vm40_vm0, %v71_v27, 0.0 }
  0xae   :  { %v75_v30 = vmul.f32 0.001953125, %v53_v26  ;;  %v74_v31 = vadd.f32 %v73_v29, %v72_v28 }
  0xb0   :  { %118 = vst.msk [vmem:[%s315_s4] sm:$0xf] %vm117_vm1, %v75_v30  ;;  %v76_v32 = vmul.f32 0.001953125, %v74_v31  ;;  %v77_v33 = vmul.f32 %v75_v30, %v75_v30  ;;  %s125_s4 = sshll.u32 %s210_s1, 4  ;;  %s126_s4 = int_to_ptr.vmem [resolvable:$true] %s125_s4 }
  0xb1   :  { %s179_s2 = scalar_lea.vmem %s126_s4, 256  ;;  %p184_p9 = scmp.lt.s32.totalorder %s126_s4, %s126_s4 }
  0xb2   :  { %v78_v34 = vsub.f32 %v76_v32, %v77_v33  ;;  %p180_p8 = scmp.ne.s32.totalorder %s126_s4, %s179_s2  ;;  %p185_p10 = scmp.lt.s32.totalorder %s179_s2, %s179_s2 }
  0xb4   :  { %v79_v35 = vmax.f32 %v78_v34, 0.0  ;;  %p186_p11 = por %p185_p10, %p184_p9 }
  0xb6   :  { %v80_v36 = vadd.f32 1e-05, %v79_v35  ;;  %119 = vst.msk [vmem:[%s316_s5] sm:$0xf] %vm117_vm1, %v79_v35  ;;  %p187_p12 = pnand %p186_p11, %p180_p8 }
  0xb8   :  { %155 = vrsqrt.f32 %v80_v36 }
  0xc2   :  { %v156_v38 = vpop.eup %155 }
  0xc3   :  { %v83_v39 = vmul.f32 %v156_v38, %v82_v37 }
  0xc5   :  { %89 = vperm.xlu0 %151, %v83_v39   ;;  %v85_v41 = vmul.f32 %v83_v39, %v75_v30 }
  0xc7   :  { %v86_v42 = vsub.f32 %v84_v40, %v85_v41 }
  0xc9   :  { %103 = vperm.xlu1 %152, %v86_v42  }
 0x144   :  { %v90_v49 = vpop.permute.xlu0 %89 }
 0x145   :  { %v97_v50 = vrot.slane %v90_v49, %v96_v48 }
 0x147   :  { %v99_v52 = vmul.f32 %v97_v50, %v256_v0  ;;  %v100_v53 = vmul.f32 %v97_v50, %v258_v1 }
 0x148   :  { %v104_v51 = vpop.permute.xlu1 %103 }
 0x149   :  { %v111_v54 = vrot.slane %v104_v51, %v96_v48 }
 0x14b   :  { %v113_v55 = vadd.f32 %v111_v54, %v99_v52  ;;  %v114_v56 = vadd.f32 %v111_v54, %v100_v53 }
 0x14d   :  { %115 = vst [vmem:[#allocation5] sm:$0xff] %v113_v55  ;;  %116 = vst [vmem:[#allocation5 + $0x8] sm:$0xff] %v114_v56 }
 0x14e   :  { %190 = shalt.err (!%p187_p12)
}
 0x14f   :  { %s191_s15 = scalar_lea.hbm %s314_s3, 256 }
 0x150   :  { %p192_p13 = scmp.ne.s32.totalorder %s314_s3, %s191_s15  ;;  %p195_p0 = scmp.lt.u32.totalorder %s191_s15, %s314_s3 }
 0x152   :  { %p197_p1 = pnand %p195_p0, %p192_p13 }
 0x154   :  { %200 = shalt.err (!%p197_p1)
}
 0x155   :  { %131 = dma.vmem_to_hbm [thread:$0]  %s126_s4, 256, %s314_s3, [#allocation4], %s206_s28, %s206_s28, %s207_s29  }
 0x156   :  { %203 = dma.done.wait [#allocation4], 256  }
 0x157   :  { %204 = vsyncadd [#allocation4], 4294967040 }
 0x158   :  { %143 = vsyncpa [#allocation3], 1 }
 0x159   :  { %144 = vsyncpa [#allocation4], 1 }

</bundles_post_ra>
